<compile_context>
chip_gen: v5e
topology: v5e:2x2
jax: 0.10.0
libtpu: 0.0.40
codegen_flags: <defaults>
</compile_context>

<pallas_src>
import functools

import jax
import jax.numpy as jnp
from jax.experimental import pallas as pl
from jax.experimental.pallas import tpu as pltpu

LANE = 128
SUBLANE = 8
_MIB = 1 << 20


def _round_up(n, m):
    return ((n + m - 1) // m) * m


def _pad2d(a, rows, cols):
    r, c = a.shape
    return jnp.pad(a, ((0, rows - r), (0, cols - c)))


def _fused_mlp_kernel(x_ref, *refs, num_hidden_layers):
    """Fused forward for the whole MLP on one batch tile.

    refs = (w0, b0, ..., w_{L-1}, b_{L-1}, w_head, b_head, y_ref, h_ref)
      x_ref : (TM, F_pad)        activation tile (weights_dtype)
      w_i   : (Din_pad, H_pad)   pre-transposed weights (VMEM resident)
      b_i   : (1, H_pad)         bias (f32)
      y_ref : (TM, O_pad)        head output (lane-padded)
      h_ref : (TM, H_pad)        last hidden activation (lane-padded)
    """
    n_params = 2 * (num_hidden_layers + 1)
    param_refs = refs[:n_params]
    y_ref, h_ref = refs[n_params], refs[n_params + 1]

    h = x_ref[...]
    # Static Python loop -> fully unrolled; back-to-back MXU matmuls with no
    # HBM traffic in between.  Accumulation is always f32.
    for li in range(num_hidden_layers):
        w = param_refs[2 * li][...]
        b = param_refs[2 * li + 1][...]
        acc = jnp.dot(h.astype(w.dtype), w, preferred_element_type=jnp.float32)
        h = jnp.maximum(acc + b, 0.0)

    w = param_refs[2 * num_hidden_layers][...]
    b = param_refs[2 * num_hidden_layers + 1][...]
    y = jnp.dot(h.astype(w.dtype), w, preferred_element_type=jnp.float32) + b

    h_ref[...] = h.astype(h_ref.dtype)
    y_ref[...] = y.astype(y_ref.dtype)


def init_mlp_params(key, num_features, num_layers, num_nodes):
    """Deterministic init mimicking torch.nn.Linear default (uniform ±1/sqrt(fan_in)).

    Weights are stored pre-transposed: (in_features, out_features).
    Matches MLPRegression: num_layers hidden layers (first F->H, rest H->H),
    then a prediction head H->1.
    """
    params = []
    dims = [num_features] + [num_nodes] * num_layers
    keys = jax.random.split(key, num_layers + 1)
    for li in range(num_layers):
        din, dout = dims[li], dims[li + 1]
        kw, kb = jax.random.split(keys[li])
        bound = 1.0 / jnp.sqrt(din)
        w_t = jax.random.uniform(kw, (din, dout), jnp.float32, -bound, bound)
        b = jax.random.uniform(kb, (dout,), jnp.float32, -bound, bound)
        params.append((w_t, b))
    kw, kb = jax.random.split(keys[num_layers])
    bound = 1.0 / jnp.sqrt(num_nodes)
    w_t = jax.random.uniform(kw, (num_nodes, 1), jnp.float32, -bound, bound)
    b = jax.random.uniform(kb, (1,), jnp.float32, -bound, bound)
    head = (w_t, b)
    return params, head


def prepare_params(params, head, *, weights_dtype=jnp.float32):
    """One-time pad/cast of all parameters to lane-aligned, MXU-friendly layout.

    Hoisted out of the forward so per-call HBM traffic is only the kernel's own
    weight DMA (no XLA pad/convert ops on every call).
    """
    L = len(params)
    F = params[0][0].shape[0]
    H = params[0][0].shape[1]
    OUT = head[0].shape[1]
    F_pad = _round_up(F, LANE)
    H_pad = _round_up(H, LANE)
    O_pad = _round_up(OUT, LANE)

    flat = []
    in_dim_pads = [F_pad] + [H_pad] * (L - 1)
    for (w, b), din_pad in zip(params, in_dim_pads):
        flat.append(_pad2d(w, din_pad, H_pad).astype(weights_dtype))
        flat.append(_pad2d(b.reshape(1, -1), 1, H_pad).astype(jnp.float32))
    wh, bh = head
    flat.append(_pad2d(wh, H_pad, O_pad).astype(weights_dtype))
    flat.append(_pad2d(bh.reshape(1, -1), 1, O_pad).astype(jnp.float32))

    meta = dict(num_layers=L, num_features=F, num_nodes=H, out_dim=OUT,
                F_pad=F_pad, H_pad=H_pad, O_pad=O_pad,
                weights_dtype=weights_dtype)
    return tuple(flat), meta


def _compute_vmem_limit(param_bytes, tile_rows, f_pad, h_pad, o_pad,
                        act_itemsize, out_itemsize, *, param_buffers, io_buffers):
    """Explicit scoped-VMEM budget: resident params + pipelined activation tiles."""
    act_in = tile_rows * f_pad * act_itemsize
    act_out = tile_rows * (h_pad + o_pad) * out_itemsize
    need = param_buffers * param_bytes + io_buffers * (act_in + act_out)
    limit = int(need * 1.5) + 4 * _MIB          # headroom: compiler scratch / sems / tiling
    limit = max(limit, 32 * _MIB)               # never below the v6e/v7x default
    cap = 56 * _MIB                             # safe even on v7x (64 MiB physical)
    try:
        vmem_cap = int(pltpu.get_tpu_info().vmem_capacity_bytes)
        cap = max(cap, min(vmem_cap - 8 * _MIB, 100 * _MIB))
    except Exception:
        pass                                     # unknown HW -> keep conservative cap
    return min(limit, cap)


def mlp_regression_forward(x, prepared, *, tile_m=512, small_batch_rows=64,
                           out_dtype=jnp.float32):
    """Reproduces MLPRegression.forward: returns (y, last hidden x).

    One pallas_call for the entire network.  Feature axes were zero-padded to
    the 128-lane width at prepare_params time (exact math; padded columns stay
    zero through matmul, bias add and ReLU).
    """
    flat, meta = prepared
    L = meta["num_layers"]
    F, H, OUT = meta["num_features"], meta["num_nodes"], meta["out_dim"]
    F_pad, H_pad, O_pad = meta["F_pad"], meta["H_pad"], meta["O_pad"]
    wdtype = meta["weights_dtype"]

    B = x.shape[0]
    assert x.shape[1] == F, (x.shape, F)

    B_pad = _round_up(B, SUBLANE)
    # Stream activations in the weights dtype (halves x DMA bytes for bf16).
    x_p = _pad2d(x, B_pad, F_pad).astype(wdtype)

    kernel = functools.partial(_fused_mlp_kernel, num_hidden_layers=L)
    param_bytes = sum(int(a.size) * a.dtype.itemsize for a in flat)
    act_itemsize = jnp.dtype(wdtype).itemsize
    out_itemsize = jnp.dtype(out_dtype).itemsize

    if B_pad <= small_batch_rows:
        # --- tiny-batch path: single fused block, one whole-array DMA each ----
        limit = _compute_vmem_limit(param_bytes, B_pad, F_pad, H_pad, O_pad,
                                    act_itemsize, out_itemsize,
                                    param_buffers=1, io_buffers=1)
        vmem = pl.BlockSpec(memory_space=pltpu.MemorySpace.VMEM)
        y_p, h_p = pl.pallas_call(
            kernel,
            out_shape=(jax.ShapeDtypeStruct((B_pad, O_pad), out_dtype),
                       jax.ShapeDtypeStruct((B_pad, H_pad), out_dtype)),
            in_specs=[vmem] * (1 + len(flat)),
            out_specs=(vmem, vmem),
            compiler_params=pltpu.CompilerParams(vmem_limit_bytes=limit),
        )(x_p, *flat)
    else:
        # --- batch-tiled path: stream activations, weights stay VMEM-resident.
        # Split into >= 2 tiles so multi-TC chips (v7x) can shard the
        # "parallel" batch axis; the extra ~0.35us step is noise on v5e/v6e.
        tm = int(min(tile_m, _round_up(pl.cdiv(B_pad, 2), SUBLANE)))
        grid = (int(pl.cdiv(B_pad, tm)),)   # partial last block handled by Pallas

        def _run(single_buffer_params):
            if single_buffer_params:
                def pspec(a):
                    return pl.BlockSpec(a.shape, lambda i: (0, 0),
                                        pipeline_mode=pl.Buffered(1))
                pbufs = 1
            else:
                def pspec(a):
                    return pl.BlockSpec(a.shape, lambda i: (0, 0))
                pbufs = 2
            limit = _compute_vmem_limit(param_bytes, tm, F_pad, H_pad, O_pad,
                                        act_itemsize, out_itemsize,
                                        param_buffers=pbufs, io_buffers=2)
            return pl.pallas_call(
                kernel,
                out_shape=(jax.ShapeDtypeStruct((B_pad, O_pad), out_dtype),
                           jax.ShapeDtypeStruct((B_pad, H_pad), out_dtype)),
                grid=grid,
                in_specs=[pl.BlockSpec((tm, F_pad), lambda i: (i, 0))]
                         + [pspec(a) for a in flat],
                out_specs=(pl.BlockSpec((tm, O_pad), lambda i: (i, 0)),
                           pl.BlockSpec((tm, H_pad), lambda i: (i, 0))),
                compiler_params=pltpu.CompilerParams(
                    dimension_semantics=("parallel",),
                    vmem_limit_bytes=limit),
            )(x_p, *flat)

        try:
            y_p, h_p = _run(True)          # single-buffered resident params
        except Exception:
            y_p, h_p = _run(False)         # fallback: default double buffering

    # Slice the real (unpadded) outputs back out.
    return y_p[:B, :OUT], h_p[:B, :H]


def _reference_forward(x, params, head):
    h = x
    for (w_t, b) in params:
        h = jnp.maximum(h @ w_t + b, 0.0)
    w_t, b = head
    return h @ w_t + b, h


if __name__ == "__main__":
    # Small, module-consistent shapes.
    batch = 8
    num_features = 16
    num_layers = 3   # one (F->H) layer plus (num_layers-1) (H->H) layers
    num_nodes = 32   # hidden width / embed dim

    key = jax.random.PRNGKey(0)
    kx, kp, kx2 = jax.random.split(key, 3)
    x = jax.random.normal(kx, (batch, num_features), jnp.float32)
    params, head = init_mlp_params(kp, num_features, num_layers, num_nodes)

    # One-time parameter preparation (pad + cast), hoisted out of the forward.
    prepared_f32 = prepare_params(params, head, weights_dtype=jnp.float32)

    # Tiny-batch (gridless) path.
    y, h = mlp_regression_forward(x, prepared_f32)
    jax.block_until_ready((y, h))
    y_ref, h_ref = _reference_forward(x, params, head)
    assert y.shape == (batch, 1)
    assert h.shape == (batch, num_nodes)
    assert jnp.allclose(y, y_ref, atol=1e-4, rtol=1e-5)
    assert jnp.allclose(h, h_ref, atol=1e-4, rtol=1e-5)

    # Batch-tiled (grid) path: non-tile-multiple batch exercises the cdiv grid,
    # the >=2-tile "parallel" split and the single-buffered resident params.
    xb = jax.random.normal(kx2, (300, num_features), jnp.float32)
    yb, hb = mlp_regression_forward(xb, prepared_f32)
    jax.block_until_ready((yb, hb))
    yb_ref, hb_ref = _reference_forward(xb, params, head)
    assert yb.shape == (300, 1) and hb.shape == (300, num_nodes)
    assert jnp.allclose(yb, yb_ref, atol=1e-4, rtol=1e-5)
    assert jnp.allclose(hb, hb_ref, atol=1e-4, rtol=1e-5)

    # bf16 weights + bf16 activation streaming (recommended on v6e/v7x):
    # halves weight residency and x/h DMA bytes; f32 accumulation retained.
    prepared_bf16 = prepare_params(params, head, weights_dtype=jnp.bfloat16)
    yb16, hb16 = mlp_regression_forward(xb, prepared_bf16)
    jax.block_until_ready((yb16, hb16))
    assert jnp.allclose(yb16, yb_ref, atol=1e-1, rtol=5e-2)
    assert jnp.allclose(hb16, hb_ref, atol=1e-1, rtol=5e-2)

    print("KERNEL_OK")
</pallas_src>

<mosaic_0001>
module attributes {stable_mosaic.version = 11 : i64} {
  func.func @_fused_mlp_kernel(%arg0: memref<8x128xf32, #tpu.memory_space<vmem>>, %arg1: memref<128x128xf32, #tpu.memory_space<vmem>>, %arg2: memref<1x128xf32, #tpu.memory_space<vmem>>, %arg3: memref<128x128xf32, #tpu.memory_space<vmem>>, %arg4: memref<1x128xf32, #tpu.memory_space<vmem>>, %arg5: memref<128x128xf32, #tpu.memory_space<vmem>>, %arg6: memref<1x128xf32, #tpu.memory_space<vmem>>, %arg7: memref<128x128xf32, #tpu.memory_space<vmem>>, %arg8: memref<1x128xf32, #tpu.memory_space<vmem>>, %arg9: memref<8x128xf32, #tpu.memory_space<vmem>>, %arg10: memref<8x128xf32, #tpu.memory_space<vmem>>) attributes {dimension_semantics = [], scalar_prefetch = 0 : i64, scratch_operands = 0 : i64, tpu.core_type = #tpu.core_type<tc>} {
    %c0 = arith.constant 0 : index
    %c0_0 = arith.constant 0 : index
    %0 = vector.load %arg0[%c0, %c0_0] : memref<8x128xf32, #tpu.memory_space<vmem>>, vector<8x128xf32>
    %c0_1 = arith.constant 0 : index
    %c0_2 = arith.constant 0 : index
    %1 = vector.load %arg1[%c0_1, %c0_2] : memref<128x128xf32, #tpu.memory_space<vmem>>, vector<128x128xf32>
    %c0_3 = arith.constant 0 : index
    %c0_4 = arith.constant 0 : index
    %2 = vector.load %arg2[%c0_3, %c0_4] : memref<1x128xf32, #tpu.memory_space<vmem>>, vector<1x128xf32>
    %cst = arith.constant dense<0.000000e+00> : vector<8x128xf32>
    %3 = tpu.matmul %0, %1, %cst {dimension_numbers = #tpu.dot_dimension_numbers<[1], [0], [0], [1], [0, 0, 1, 1], [], []>} : vector<8x128xf32>, vector<128x128xf32>, vector<8x128xf32> -> vector<8x128xf32>
    %4 = vector.broadcast %2 : vector<1x128xf32> to vector<8x128xf32>
    %5 = arith.addf %3, %4 : vector<8x128xf32>
    %cst_5 = arith.constant 0.000000e+00 : f32
    %6 = vector.broadcast %cst_5 : f32 to vector<8x128xf32>
    %7 = arith.maximumf %5, %6 : vector<8x128xf32>
    %c0_6 = arith.constant 0 : index
    %c0_7 = arith.constant 0 : index
    %8 = vector.load %arg3[%c0_6, %c0_7] : memref<128x128xf32, #tpu.memory_space<vmem>>, vector<128x128xf32>
    %c0_8 = arith.constant 0 : index
    %c0_9 = arith.constant 0 : index
    %9 = vector.load %arg4[%c0_8, %c0_9] : memref<1x128xf32, #tpu.memory_space<vmem>>, vector<1x128xf32>
    %cst_10 = arith.constant dense<0.000000e+00> : vector<8x128xf32>
    %10 = tpu.matmul %7, %8, %cst_10 {dimension_numbers = #tpu.dot_dimension_numbers<[1], [0], [0], [1], [0, 0, 1, 1], [], []>} : vector<8x128xf32>, vector<128x128xf32>, vector<8x128xf32> -> vector<8x128xf32>
    %11 = vector.broadcast %9 : vector<1x128xf32> to vector<8x128xf32>
    %12 = arith.addf %10, %11 : vector<8x128xf32>
    %cst_11 = arith.constant 0.000000e+00 : f32
    %13 = vector.broadcast %cst_11 : f32 to vector<8x128xf32>
    %14 = arith.maximumf %12, %13 : vector<8x128xf32>
    %c0_12 = arith.constant 0 : index
    %c0_13 = arith.constant 0 : index
    %15 = vector.load %arg5[%c0_12, %c0_13] : memref<128x128xf32, #tpu.memory_space<vmem>>, vector<128x128xf32>
    %c0_14 = arith.constant 0 : index
    %c0_15 = arith.constant 0 : index
    %16 = vector.load %arg6[%c0_14, %c0_15] : memref<1x128xf32, #tpu.memory_space<vmem>>, vector<1x128xf32>
    %cst_16 = arith.constant dense<0.000000e+00> : vector<8x128xf32>
    %17 = tpu.matmul %14, %15, %cst_16 {dimension_numbers = #tpu.dot_dimension_numbers<[1], [0], [0], [1], [0, 0, 1, 1], [], []>} : vector<8x128xf32>, vector<128x128xf32>, vector<8x128xf32> -> vector<8x128xf32>
    %18 = vector.broadcast %16 : vector<1x128xf32> to vector<8x128xf32>
    %19 = arith.addf %17, %18 : vector<8x128xf32>
    %cst_17 = arith.constant 0.000000e+00 : f32
    %20 = vector.broadcast %cst_17 : f32 to vector<8x128xf32>
    %21 = arith.maximumf %19, %20 : vector<8x128xf32>
    %c0_18 = arith.constant 0 : index
    %c0_19 = arith.constant 0 : index
    %22 = vector.load %arg7[%c0_18, %c0_19] : memref<128x128xf32, #tpu.memory_space<vmem>>, vector<128x128xf32>
    %c0_20 = arith.constant 0 : index
    %c0_21 = arith.constant 0 : index
    %23 = vector.load %arg8[%c0_20, %c0_21] : memref<1x128xf32, #tpu.memory_space<vmem>>, vector<1x128xf32>
    %cst_22 = arith.constant dense<0.000000e+00> : vector<8x128xf32>
    %24 = tpu.matmul %21, %22, %cst_22 {dimension_numbers = #tpu.dot_dimension_numbers<[1], [0], [0], [1], [0, 0, 1, 1], [], []>} : vector<8x128xf32>, vector<128x128xf32>, vector<8x128xf32> -> vector<8x128xf32>
    %25 = vector.broadcast %23 : vector<1x128xf32> to vector<8x128xf32>
    %26 = arith.addf %24, %25 : vector<8x128xf32>
    %c0_23 = arith.constant 0 : index
    %c0_24 = arith.constant 0 : index
    %27 = vector.load %arg10[%c0_23, %c0_24] : memref<8x128xf32, #tpu.memory_space<vmem>>, vector<8x128xf32>
    tpu.vector_store %arg10[%c0_23, %c0_24], %21 {strides = array<i32>} : memref<8x128xf32, #tpu.memory_space<vmem>>, vector<8x128xf32>,
    %c0_25 = arith.constant 0 : index
    %c0_26 = arith.constant 0 : index
    %28 = vector.load %arg9[%c0_25, %c0_26] : memref<8x128xf32, #tpu.memory_space<vmem>>, vector<8x128xf32>
    tpu.vector_store %arg9[%c0_25, %c0_26], %26 {strides = array<i32>} : memref<8x128xf32, #tpu.memory_space<vmem>>, vector<8x128xf32>,
    return
  }
}

</mosaic_0001>

<bundles_post_ra>
// kernel: tpu_custom_call.1
= control target key start
LH: loop header
LB: loop body
LE: loop exit
PB: predicated region body
PF: predicated region fallthrough
CT: control target
= control target key end

     0   :  { %16 = vsyncpa [#allocation3], 0  ;;  %s601_s0 = inlined_call_operand.hbm [shape: f32[8,128], index: 0, kind: input, shape index: {}]   ;;  %s602_s1 = inlined_call_operand.hbm [shape: f32[128,128], index: 1, kind: input, shape index: {}]   ;;  %s603_s2 = inlined_call_operand.vmem [shape: f32[1,128], index: 2, kind: input, shape index: {}]   ;;  %s604_s3 = inlined_call_operand.hbm [shape: f32[128,128], index: 3, kind: input, shape index: {}]   ;;  %s605_s4 = inlined_call_operand.vmem [shape: f32[1,128], index: 4, kind: input, shape index: {}]   ;;  %s606_s5 = inlined_call_operand.hbm [shape: f32[128,128], index: 5, kind: input, shape index: {}]   ;;  %s607_s6 = inlined_call_operand.vmem [shape: f32[1,128], index: 6, kind: input, shape index: {}]   ;;  %s608_s7 = inlined_call_operand.hbm [shape: f32[128,128], index: 7, kind: input, shape index: {}]   ;;  %s609_s8 = inlined_call_operand.vmem [shape: f32[1,128], index: 8, kind: input, shape index: {}]   ;;  %s610_s9 = inlined_call_operand.hbm [shape: f32[8,128], index: 9, kind: output, shape index: {0}]   ;;  %s611_s10 = inlined_call_operand.hbm [shape: f32[8,128], index: 10, kind: output, shape index: {1}]  }
   0x1   :  { %17 = vsyncpa [#allocation6], 0 }
   0x2   :  { %18 = vsyncpa [#allocation9], 0 }
   0x3   :  { %19 = vsyncpa [#allocation4], 0  ;;  %s36_s15 = sshll.u32 %s602_s1, 4  ;;  %s37_s15 = int_to_ptr.hbm [resolvable:$true] %s36_s15 }
   0x4   :  { %20 = vsyncpa [#allocation13], 0  ;;  %s504_s16 = smov [#allocation5]   ;;  %s66_s20 = sshll.u32 %s606_s5, 4  ;;  %s67_s20 = int_to_ptr.hbm [resolvable:$true] %s66_s20 }
   0x5   :  { %s38_s17 = sshll.u32 %s504_s16, 4  ;;  %s505_s21 = smov 128   ;;  %s39_s17 = int_to_ptr.vmem [resolvable:$true] %s38_s17 }
   0x6   :  { %s506_s22 = smov 8   ;;  %s507_s23 = smov [#allocation8]  }
   0x7   :  { %44 = dma.hbm_to_vmem [thread:$0]  %s37_s15, 2048, %s39_s17, [#allocation6], %s505_s21, %s505_s21, %s506_s22  }
   0x8   :  { %s68_s24 = sshll.u32 %s507_s23, 4  ;;  %s26_s27 = sshll.u32 %s601_s0, 4  ;;  %s69_s24 = int_to_ptr.vmem [resolvable:$true] %s68_s24  ;;  %s27_s27 = int_to_ptr.hbm [resolvable:$true] %s26_s27 }
   0x9   :  { %74 = dma.hbm_to_vmem [thread:$0]  %s67_s20, 2048, %s69_s24, [#allocation9], %s505_s21, %s505_s21, %s506_s22  }
   0xa   :  { %s51_s29 = sshll.u32 %s604_s3, 4  ;;  %s508_s30 = smov [#allocation2]   ;;  %s52_s29 = int_to_ptr.hbm [resolvable:$true] %s51_s29 }
   0xb   :  { %s28_s11 = sshll.u32 %s508_s30, 4  ;;  %s509_s5 = smov [#allocation7]   ;;  %s29_s11 = int_to_ptr.vmem [resolvable:$true] %s28_s11 }
   0xc   :  { %31 = dma.hbm_to_vmem [thread:$0]  %s27_s27, 128, %s29_s11, [#allocation3]  }
   0xd   :  { %s53_s12 = sshll.u32 %s509_s5, 4  ;;  %s81_s15 = sshll.u32 %s608_s7, 4  ;;  %s54_s12 = int_to_ptr.vmem [resolvable:$true] %s53_s12  ;;  %s82_s15 = int_to_ptr.hbm [resolvable:$true] %s81_s15 }
   0xe   :  { %59 = dma.hbm_to_vmem [thread:$0]  %s52_s29, 2048, %s54_s12, [#allocation6], %s505_s21, %s505_s21, %s506_s22  }
   0xf   :  { %s510_s0 = smov [#allocation10]  }
  0x10   :  { %s83_s16 = sshll.u32 %s510_s0, 4  ;;  %s84_s16 = int_to_ptr.vmem [resolvable:$true] %s83_s16 }
  0x11   :  { %89 = dma.hbm_to_vmem [thread:$0]  %s82_s15, 2048, %s84_s16, [#allocation9], %s505_s21, %s505_s21, %s506_s22  }
  0x12   :  { %494 = dma.done.wait [#allocation3], 128  }
  0x13   :  { %495 = vsyncadd [#allocation3], 4294967168 }
  0x14   :  { %496 = dma.done.wait [#allocation6], 4096  }
  0x15   :  { %497 = vsyncadd [#allocation6], 4294963200 }
  0x16   :  { %498 = dma.done.wait [#allocation9], 4096  }
  0x17   :  { %499 = vsyncadd [#allocation9], 4294963200  ;;  %v128_v0 = vld [vmem:[#allocation5 + $0x78] sm:$0xff]  ;;  %v127_v1 = vld [vmem:[#allocation5 + $0x70] sm:$0xff]  ;;  %s296_s23 = sshll.u32 %s611_s10, 4  ;;  %s512_s26 = smov [#allocation11]   ;;  %s297_s23 = int_to_ptr.hbm [resolvable:$true] %s296_s23 }
  0x18   :  { %133 = vmatpush.msra.mxu0 %v128_v0  ;;  %v126_v2 = vld [vmem:[#allocation5 + $0x68] sm:$0xff]  ;;  %v125_v3 = vld [vmem:[#allocation5 + $0x60] sm:$0xff]  ;;  %v169_v4 = vld [vmem:[#allocation7 + $0x78] sm:$0xff]  ;;  %s285_s28 = sshll.u32 %s610_s9, 4  ;;  %s286_s28 = int_to_ptr.hbm [resolvable:$true] %s285_s28 }
  0x19   :  { %v124_v5 = vld [vmem:[#allocation5 + $0x58] sm:$0xff]  ;;  %174 = vmatpush.msra.mxu1 %v169_v4  ;;  %v168_v6 = vld [vmem:[#allocation7 + $0x70] sm:$0xff]  ;;  %v167_v7 = vld [vmem:[#allocation7 + $0x68] sm:$0xff] }
  0x1a   :  { %134 = vmatpush.msra.mxu0 %v127_v1  ;;  %v123_v8 = vld [vmem:[#allocation5 + $0x50] sm:$0xff]  ;;  %v166_v9 = vld [vmem:[#allocation7 + $0x60] sm:$0xff]  ;;  %v122_v10 = vld [vmem:[#allocation5 + $0x48] sm:$0xff] }
  0x1b   :  { %175 = vmatpush.msra.mxu1 %v168_v6  ;;  %v165_v11 = vld [vmem:[#allocation7 + $0x58] sm:$0xff]  ;;  %v121_v12 = vld [vmem:[#allocation5 + $0x40] sm:$0xff]  ;;  %v164_v13 = vld [vmem:[#allocation7 + $0x50] sm:$0xff] }
  0x1c   :  { %135 = vmatpush.msra.mxu0 %v126_v2  ;;  %v120_v14 = vld [vmem:[#allocation5 + $0x38] sm:$0xff]  ;;  %v163_v15 = vld [vmem:[#allocation7 + $0x48] sm:$0xff]  ;;  %v119_v16 = vld [vmem:[#allocation5 + $0x30] sm:$0xff] }
  0x1d   :  { %176 = vmatpush.msra.mxu1 %v167_v7  ;;  %v162_v17 = vld [vmem:[#allocation7 + $0x40] sm:$0xff]  ;;  %v118_v18 = vld [vmem:[#allocation5 + $0x28] sm:$0xff]  ;;  %v161_v19 = vld [vmem:[#allocation7 + $0x38] sm:$0xff] }
  0x1e   :  { %136 = vmatpush.msra.mxu0 %v125_v3  ;;  %v117_v20 = vld [vmem:[#allocation5 + $0x20] sm:$0xff]  ;;  %v160_v21 = vld [vmem:[#allocation7 + $0x30] sm:$0xff]  ;;  %v116_v22 = vld [vmem:[#allocation5 + $0x18] sm:$0xff] }
  0x1f   :  { %177 = vmatpush.msra.mxu1 %v166_v9  ;;  %v159_v23 = vld [vmem:[#allocation7 + $0x28] sm:$0xff]  ;;  %v115_v24 = vld [vmem:[#allocation5 + $0x10] sm:$0xff]  ;;  %v158_v25 = vld [vmem:[#allocation7 + $0x20] sm:$0xff] }
  0x20   :  { %137 = vmatpush.msra.mxu0 %v124_v5  ;;  %v114_v26 = vld [vmem:[#allocation5 + $0x8] sm:$0xff]  ;;  %v157_v27 = vld [vmem:[#allocation7 + $0x18] sm:$0xff]  ;;  %v113_v28 = vld [vmem:[#allocation5] sm:$0xff] }
  0x21   :  { %178 = vmatpush.msra.mxu1 %v165_v11  ;;  %v112_v29 = vld [vmem:[#allocation2] sm:$0xff]  ;;  %v156_v30 = vld [vmem:[#allocation7 + $0x10] sm:$0xff]  ;;  %v155_v31 = vld [vmem:[#allocation7 + $0x8] sm:$0xff] }
  0x22   :  { %138 = vmatpush.msra.mxu0 %v123_v8  ;;  %v154_v32 = vld [vmem:[#allocation7] sm:$0xff]  ;;  %v210_v33 = vld [vmem:[#allocation8 + $0x78] sm:$0xff]  ;;  %v209_v34 = vld [vmem:[#allocation8 + $0x70] sm:$0xff] }
  0x23   :  { %179 = vmatpush.msra.mxu1 %v164_v13  ;;  %215 = vmatpush.msra.mxu2 %v210_v33  ;;  %v208_v35 = vld [vmem:[#allocation8 + $0x68] sm:$0xff]  ;;  %v207_v36 = vld [vmem:[#allocation8 + $0x60] sm:$0xff]  ;;  %v206_v37 = vld [vmem:[#allocation8 + $0x58] sm:$0xff] }
  0x24   :  { %139 = vmatpush.msra.mxu0 %v122_v10  ;;  %v205_v38 = vld [vmem:[#allocation8 + $0x50] sm:$0xff]  ;;  %v204_v39 = vld [vmem:[#allocation8 + $0x48] sm:$0xff]  ;;  %v203_v40 = vld [vmem:[#allocation8 + $0x40] sm:$0xff] }
  0x25   :  { %180 = vmatpush.msra.mxu1 %v163_v15  ;;  %216 = vmatpush.msra.mxu2 %v209_v34  ;;  %v202_v41 = vld [vmem:[#allocation8 + $0x38] sm:$0xff]  ;;  %v201_v42 = vld [vmem:[#allocation8 + $0x30] sm:$0xff]  ;;  %v200_v43 = vld [vmem:[#allocation8 + $0x28] sm:$0xff] }
  0x26   :  { %140 = vmatpush.msra.mxu0 %v121_v12  ;;  %v199_v44 = vld [vmem:[#allocation8 + $0x20] sm:$0xff]  ;;  %v198_v45 = vld [vmem:[#allocation8 + $0x18] sm:$0xff]  ;;  %v197_v50 = vld [vmem:[#allocation8 + $0x10] sm:$0xff] }
  0x27   :  { %181 = vmatpush.msra.mxu1 %v162_v17  ;;  %217 = vmatpush.msra.mxu2 %v208_v35  ;;  %v322_v46 = vld [vmem:[%s603_s2] ss:$0 sm:$0xff]  ;;  %v196_v51 = vld [vmem:[#allocation8 + $0x8] sm:$0xff]  ;;  %v195_v52 = vld [vmem:[#allocation8] sm:$0xff] }
  0x28   :  { %141 = vmatpush.msra.mxu0 %v120_v14  ;;  %v251_v53 = vld [vmem:[#allocation10 + $0x78] sm:$0xff]  ;;  %v250_v54 = vld [vmem:[#allocation10 + $0x70] sm:$0xff]  ;;  %v249_v55 = vld [vmem:[#allocation10 + $0x68] sm:$0xff] }
  0x29   :  { %182 = vmatpush.msra.mxu1 %v161_v19  ;;  %218 = vmatpush.msra.mxu2 %v207_v36  ;;  %v248_v56 = vld [vmem:[#allocation10 + $0x60] sm:$0xff]  ;;  %v247_v57 = vld [vmem:[#allocation10 + $0x58] sm:$0xff]  ;;  %v246_v58 = vld [vmem:[#allocation10 + $0x50] sm:$0xff] }
  0x2a   :  { %142 = vmatpush.msra.mxu0 %v119_v16  ;;  %256 = vmatpush.msra.mxu3 %v251_v53  ;;  %v245_v59 = vld [vmem:[#allocation10 + $0x48] sm:$0xff]  ;;  %v244_v60 = vld [vmem:[#allocation10 + $0x40] sm:$0xff]  ;;  %v243_v61 = vld [vmem:[#allocation10 + $0x38] sm:$0xff] }
  0x2b   :  { %183 = vmatpush.msra.mxu1 %v160_v21  ;;  %219 = vmatpush.msra.mxu2 %v206_v37  ;;  %v242_v62 = vld [vmem:[#allocation10 + $0x30] sm:$0xff]  ;;  %v241_v63 = vld [vmem:[#allocation10 + $0x28] sm:$0xff]  ;;  %v240_v0 = vld [vmem:[#allocation10 + $0x20] sm:$0xff] }
  0x2c   :  { %143 = vmatpush.msra.mxu0 %v118_v18  ;;  %257 = vmatpush.msra.mxu3 %v250_v54  ;;  %v239_v1 = vld [vmem:[#allocation10 + $0x18] sm:$0xff]  ;;  %v238_v6 = vld [vmem:[#allocation10 + $0x10] sm:$0xff]  ;;  %v237_v7 = vld [vmem:[#allocation10 + $0x8] sm:$0xff] }
  0x2d   :  { %184 = vmatpush.msra.mxu1 %v159_v23  ;;  %220 = vmatpush.msra.mxu2 %v205_v38  ;;  %v323_v2 = vld [vmem:[%s605_s4] ss:$0 sm:$0xff]  ;;  %v236_v8 = vld [vmem:[#allocation10] sm:$0xff]  ;;  %s511_s4 = smov [#allocation12]  }
  0x2e   :  { %144 = vmatpush.msra.mxu0 %v117_v20  ;;  %258 = vmatpush.msra.mxu3 %v249_v55  ;;  %v324_v9 = vld [vmem:[%s607_s6] ss:$0 sm:$0xff]  ;;  %s294_s20 = sshll.u32 %s511_s4, 4  ;;  %s283_s6 = sshll.u32 %s512_s26, 4  ;;  %s295_s20 = int_to_ptr.vmem [resolvable:$true] %s294_s20  ;;  %s284_s6 = int_to_ptr.vmem [resolvable:$true] %s283_s6 }
  0x2f   :  { %185 = vmatpush.msra.mxu1 %v158_v25  ;;  %221 = vmatpush.msra.mxu2 %v204_v39  ;;  %v325_v13 = vld [vmem:[%s609_s8] ss:$0 sm:$0xff] }
  0x30   :  { %145 = vmatpush.msra.mxu0 %v116_v22  ;;  %259 = vmatpush.msra.mxu3 %v248_v56 }
  0x31   :  { %186 = vmatpush.msra.mxu1 %v157_v27  ;;  %222 = vmatpush.msra.mxu2 %v203_v40 }
  0x32   :  { %146 = vmatpush.msra.mxu0 %v115_v24  ;;  %260 = vmatpush.msra.mxu3 %v247_v57 }
  0x33   :  { %187 = vmatpush.msra.mxu1 %v156_v30  ;;  %223 = vmatpush.msra.mxu2 %v202_v41 }
  0x34   :  { %147 = vmatpush.msra.mxu0 %v114_v26  ;;  %261 = vmatpush.msra.mxu3 %v246_v58 }
  0x35   :  { %188 = vmatpush.msra.mxu1 %v155_v31  ;;  %224 = vmatpush.msra.mxu2 %v201_v42 }
  0x36   :  { %148 = vmatpush.msra.mxu0 %v113_v28  ;;  %262 = vmatpush.msra.mxu3 %v245_v59 }
  0x37   :  { %149 = vmatmul.f32.vlgmr.msra.gmra.mxu0 %v112_v29  ;;  %189 = vmatpush.msra.mxu1 %v154_v32 }
  0x38   :  { %225 = vmatpush.msra.mxu2 %v200_v43  ;;  %263 = vmatpush.msra.mxu3 %v244_v60 }
  0x3a   :  { %226 = vmatpush.msra.mxu2 %v199_v44  ;;  %264 = vmatpush.msra.mxu3 %v243_v61 }
  0x3c   :  { %227 = vmatpush.msra.mxu2 %v198_v45  ;;  %265 = vmatpush.msra.mxu3 %v242_v62 }
  0x3e   :  { %228 = vmatpush.msra.mxu2 %v197_v50  ;;  %266 = vmatpush.msra.mxu3 %v241_v63 }
  0x40   :  { %229 = vmatpush.msra.mxu2 %v196_v51  ;;  %267 = vmatpush.msra.mxu3 %v240_v0 }
  0x42   :  { %230 = vmatpush.msra.mxu2 %v195_v52  ;;  %268 = vmatpush.msra.mxu3 %v239_v1 }
  0x44   :  { %269 = vmatpush.msra.mxu3 %v238_v6 }
  0x46   :  { %270 = vmatpush.msra.mxu3 %v237_v7 }
  0x48   :  { %271 = vmatpush.msra.mxu3 %v236_v8 }
  0xb4   :  { %v150_v47 = vpop.f32.mrf.mxu0 }
  0xb5   :  { %v151_v48 = vadd.f32 %v322_v46, %v150_v47 }
  0xb7   :  { %v153_v49 = vmax.f32 %v151_v48, 0.0 }
  0xb9   :  { %190 = vmatmul.f32.vlgmr.msra.gmra.mxu1 %v153_v49 }
 0x136   :  { %v191_v3 = vpop.f32.mrf.mxu1 }
 0x137   :  { %v192_v4 = vadd.f32 %v323_v2, %v191_v3 }
 0x139   :  { %v194_v5 = vmax.f32 %v192_v4, 0.0 }
 0x13b   :  { %231 = vmatmul.f32.vlgmr.msra.gmra.mxu2 %v194_v5 }
 0x1be   :  { %v232_v10 = vpop.f32.mrf.mxu2 }
 0x1bf   :  { %v233_v11 = vadd.f32 %v324_v9, %v232_v10 }
 0x1c1   :  { %v235_v12 = vmax.f32 %v233_v11, 0.0 }
 0x1c3   :  { %276 = vst [vmem:[#allocation12] sm:$0xff] %v235_v12  ;;  %272 = vmatmul.f32.vlgmr.msra.gmra.mxu3 %v235_v12 }
 0x1c4   :  { %299 = dma.vmem_to_hbm [thread:$0]  %s295_s20, 128, %s297_s23, [#allocation13]  }
 0x246   :  { %v273_v14 = vpop.f32.mrf.mxu3 }
 0x247   :  { %v274_v15 = vadd.f32 %v325_v13, %v273_v14 }
 0x249   :  { %277 = vst [vmem:[#allocation11] sm:$0xff] %v274_v15 }
 0x24a   :  { %288 = dma.vmem_to_hbm [thread:$0]  %s284_s6, 128, %s286_s28, [#allocation4]  }
 0x24b   :  { %500 = dma.done.wait [#allocation4], 128  }
 0x24c   :  { %501 = vsyncadd [#allocation4], 4294967168 }
 0x24d   :  { %502 = dma.done.wait [#allocation13], 128  }
 0x24e   :  { %503 = vsyncadd [#allocation13], 4294967168 }
 0x24f   :  { %308 = vsyncpa [#allocation3], 1 }
 0x250   :  { %309 = vsyncpa [#allocation6], 1 }
 0x251   :  { %310 = vsyncpa [#allocation9], 1 }
 0x252   :  { %311 = vsyncpa [#allocation4], 1 }
 0x253   :  { %312 = vsyncpa [#allocation13], 1 }

</bundles_post_ra>
